<compile_context>
chip_gen: v5e
topology: v5e:2x2
jax: 0.10.0
libtpu: 0.0.40
codegen_flags: <defaults>
</compile_context>

<pallas_src>
import functools

import jax
import jax.numpy as jnp
from jax import lax
from jax.experimental import pallas as pl
from jax.experimental.pallas import tpu as pltpu


def _layernorm_cnn_kernel(x_ref, w_ref, b_ref, o_ref, *, eps, inv_count):
    # x_ref: (B_TILE, C, HW) block; w_ref/b_ref: (C, 1) per-channel affine.
    x = x_ref[...].astype(jnp.float32)  # identity for f32 inputs

    # Single fused stats sweep: independent sum / sum-of-squares per sample,
    # accumulated in f32.
    s = jnp.sum(x, axis=(1, 2), keepdims=True)             # (B_TILE, 1, 1)
    ss = jnp.sum(x * x, axis=(1, 2), keepdims=True)        # (B_TILE, 1, 1)
    mean = s * inv_count
    var = jnp.maximum(ss * inv_count - mean * mean, 0.0)   # guard cancellation
    inv_std = lax.rsqrt(var + eps)

    # Fold normalization + per-channel affine into one FMA-style pass:
    #   o = x * scale + shift,  scale = w * inv_std,  shift = b - mean * scale
    w = w_ref[...].astype(jnp.float32)                     # (C, 1)
    b = b_ref[...].astype(jnp.float32)                     # (C, 1)
    scale = w * inv_std                                    # (B_TILE, C, 1)
    shift = b - mean * scale                               # (B_TILE, C, 1)
    o_ref[...] = (x * scale + shift).astype(o_ref.dtype)


def _pick_batch_tile(n, c, hw, itemsize, block_budget_bytes=4 * 1024 * 1024):
    """Samples per grid step: fill the VMEM block budget (cap 32), but keep at
    least 2 grid steps when N >= 2 so the parallel batch axis can shard across
    TensorCores (v7x megacore)."""
    per_sample = max(c * hw * itemsize, 1)
    bt = int(max(1, min(n, block_budget_bytes // per_sample, 32)))
    while bt > 1 and pl.cdiv(n, bt) < 2:
        bt = pl.cdiv(bt, 2)
    return bt


def layernorm_cnn(x, weight, bias, eps=1e-5):
    """x: (N, C, H, W); weight, bias: (1, C, 1, 1). Returns (N, C, H, W)."""
    n, c, h, w = x.shape
    hw = h * w
    x2 = x.reshape(n, c, hw)
    w2 = weight.reshape(c, 1)
    b2 = bias.reshape(c, 1)

    b_tile = _pick_batch_tile(n, c, hw, x.dtype.itemsize)
    grid = (pl.cdiv(n, b_tile),)

    kernel = functools.partial(
        _layernorm_cnn_kernel, eps=float(eps), inv_count=1.0 / float(c * hw))

    out = pl.pallas_call(
        kernel,
        out_shape=jax.ShapeDtypeStruct((n, c, hw), x.dtype),
        grid_spec=pltpu.PrefetchScalarGridSpec(
            num_scalar_prefetch=0,
            grid=grid,
            in_specs=[
                # B_TILE samples' (C, HW) slabs per grid step.
                pl.BlockSpec((b_tile, c, hw), lambda i: (i, 0, 0)),
                # Per-channel affine params, same block every step.
                pl.BlockSpec((c, 1), lambda i: (0, 0)),
                pl.BlockSpec((c, 1), lambda i: (0, 0)),
            ],
            out_specs=pl.BlockSpec((b_tile, c, hw), lambda i: (i, 0, 0)),
        ),
        compiler_params=pltpu.CompilerParams(
            dimension_semantics=("parallel",),
            vmem_limit_bytes=32 * 1024 * 1024,
        ),
    )(x2, w2, b2)

    return out.reshape(n, c, h, w)


if __name__ == "__main__":
    key = jax.random.PRNGKey(0)
    N, C, H, W = 2, 4, 16, 16

    x = jax.random.normal(key, (N, C, H, W), dtype=jnp.float32)
    # nn.Parameter init: weight = ones(1, C, 1, 1), bias = zeros(1, C, 1, 1)
    weight = jnp.ones((1, C, 1, 1), dtype=jnp.float32)
    bias = jnp.zeros((1, C, 1, 1), dtype=jnp.float32)

    out = layernorm_cnn(x, weight, bias, eps=1e-5)
    jax.block_until_ready(out)

    # Pure-JAX reference check of the PyTorch semantics.
    mean = jnp.mean(x, axis=(1, 2, 3), keepdims=True)
    var = jnp.mean((x - mean) ** 2, axis=(1, 2, 3), keepdims=True)
    ref = weight * ((x - mean) / jnp.sqrt(var + 1e-5)) + bias
    assert jnp.allclose(out, ref, atol=1e-4, rtol=1e-4), "mismatch vs reference"

    print("KERNEL_OK")
</pallas_src>

<mosaic_0001>
module attributes {stable_mosaic.version = 11 : i64} {
  func.func @_layernorm_cnn_kernel(%arg0: i32, %arg1: memref<1x4x256xf32, #tpu.memory_space<vmem>>, %arg2: memref<4x1xf32, #tpu.memory_space<vmem>>, %arg3: memref<4x1xf32, #tpu.memory_space<vmem>>, %arg4: memref<1x4x256xf32, #tpu.memory_space<vmem>>) attributes {dimension_semantics = [#tpu.dimension_semantics<parallel>], iteration_bounds = array<i64: 2>, scalar_prefetch = 0 : i64, scratch_operands = 0 : i64, tpu.core_type = #tpu.core_type<tc>, window_params = [{transform_indices = @transform_0, window_bounds = array<i64: 1, 4, 256>}, {pipeline_mode = #tpu.pipeline_mode<synchronous>, transform_indices = @transform_1, window_bounds = array<i64: 4, 1>}, {pipeline_mode = #tpu.pipeline_mode<synchronous>, transform_indices = @transform_2, window_bounds = array<i64: 4, 1>}, {transform_indices = @transform_3, window_bounds = array<i64: 1, 4, 256>}]} {
    %c0 = arith.constant 0 : index
    %c0_0 = arith.constant 0 : index
    %c0_1 = arith.constant 0 : index
    %0 = vector.load %arg1[%c0, %c0_0, %c0_1] : memref<1x4x256xf32, #tpu.memory_space<vmem>>, vector<1x4x256xf32>
    %cst = arith.constant dense<0.000000e+00> : vector<1xf32>
    %1 = vector.multi_reduction <add>, %0, %cst [1, 2] : vector<1x4x256xf32> to vector<1xf32>
    %2 = vector.shape_cast %1 : vector<1xf32> to vector<1x1x1xf32>
    %3 = arith.mulf %0, %0 : vector<1x4x256xf32>
    %cst_2 = arith.constant dense<0.000000e+00> : vector<1xf32>
    %4 = vector.multi_reduction <add>, %3, %cst_2 [1, 2] : vector<1x4x256xf32> to vector<1xf32>
    %5 = vector.shape_cast %4 : vector<1xf32> to vector<1x1x1xf32>
    %cst_3 = arith.constant 9.765625E-4 : f32
    %6 = vector.broadcast %cst_3 : f32 to vector<1x1x1xf32>
    %7 = arith.mulf %2, %6 : vector<1x1x1xf32>
    %cst_4 = arith.constant 9.765625E-4 : f32
    %8 = vector.broadcast %cst_4 : f32 to vector<1x1x1xf32>
    %9 = arith.mulf %5, %8 : vector<1x1x1xf32>
    %10 = arith.mulf %7, %7 : vector<1x1x1xf32>
    %11 = arith.subf %9, %10 : vector<1x1x1xf32>
    %cst_5 = arith.constant 0.000000e+00 : f32
    %12 = vector.broadcast %cst_5 : f32 to vector<1x1x1xf32>
    %13 = arith.maximumf %11, %12 : vector<1x1x1xf32>
    %cst_6 = arith.constant 9.99999974E-6 : f32
    %14 = vector.broadcast %cst_6 : f32 to vector<1x1x1xf32>
    %15 = arith.addf %13, %14 : vector<1x1x1xf32>
    %16 = math.rsqrt %15 : vector<1x1x1xf32>
    %c0_7 = arith.constant 0 : index
    %c0_8 = arith.constant 0 : index
    %17 = vector.load %arg2[%c0_7, %c0_8] : memref<4x1xf32, #tpu.memory_space<vmem>>, vector<4x1xf32>
    %c0_9 = arith.constant 0 : index
    %c0_10 = arith.constant 0 : index
    %18 = vector.load %arg3[%c0_9, %c0_10] : memref<4x1xf32, #tpu.memory_space<vmem>>, vector<4x1xf32>
    %19 = vector.shape_cast %17 : vector<4x1xf32> to vector<1x4x1xf32>
    %20 = vector.broadcast %16 : vector<1x1x1xf32> to vector<1x4x1xf32>
    %21 = arith.mulf %19, %20 : vector<1x4x1xf32>
    %22 = vector.broadcast %7 : vector<1x1x1xf32> to vector<1x4x1xf32>
    %23 = arith.mulf %22, %21 : vector<1x4x1xf32>
    %24 = vector.shape_cast %18 : vector<4x1xf32> to vector<1x4x1xf32>
    %25 = arith.subf %24, %23 : vector<1x4x1xf32>
    %26 = vector.broadcast %21 : vector<1x4x1xf32> to vector<1x4x256xf32>
    %27 = arith.mulf %0, %26 : vector<1x4x256xf32>
    %28 = vector.broadcast %25 : vector<1x4x1xf32> to vector<1x4x256xf32>
    %29 = arith.addf %27, %28 : vector<1x4x256xf32>
    %c0_11 = arith.constant 0 : index
    %c0_12 = arith.constant 0 : index
    %c0_13 = arith.constant 0 : index
    %30 = vector.load %arg4[%c0_11, %c0_12, %c0_13] : memref<1x4x256xf32, #tpu.memory_space<vmem>>, vector<1x4x256xf32>
    tpu.vector_store %arg4[%c0_11, %c0_12, %c0_13], %29 {strides = array<i32>} : memref<1x4x256xf32, #tpu.memory_space<vmem>>, vector<1x4x256xf32>,
    return
  }
  func.func @transform_0(%arg0: i32) -> (i32, i32, i32) {
    %c0_i32 = arith.constant 0 : i32
    %c0_i32_0 = arith.constant 0 : i32
    %c0_i32_1 = arith.constant 0 : i32
    return %arg0, %c0_i32, %c0_i32_0 : i32, i32, i32
  }
  func.func @transform_1(%arg0: i32) -> (i32, i32) {
    %c0_i32 = arith.constant 0 : i32
    %c0_i32_0 = arith.constant 0 : i32
    %c0_i32_1 = arith.constant 0 : i32
    return %c0_i32, %c0_i32_0 : i32, i32
  }
  func.func @transform_2(%arg0: i32) -> (i32, i32) {
    %c0_i32 = arith.constant 0 : i32
    %c0_i32_0 = arith.constant 0 : i32
    %c0_i32_1 = arith.constant 0 : i32
    return %c0_i32, %c0_i32_0 : i32, i32
  }
  func.func @transform_3(%arg0: i32) -> (i32, i32, i32) {
    %c0_i32 = arith.constant 0 : i32
    %c0_i32_0 = arith.constant 0 : i32
    %c0_i32_1 = arith.constant 0 : i32
    return %arg0, %c0_i32, %c0_i32_0 : i32, i32, i32
  }
}

</mosaic_0001>

<bundles_post_ra>
// kernel: tpu_custom_call.1
= control target key start
LH: loop header
LB: loop body
LE: loop exit
PB: predicated region body
PF: predicated region fallthrough
CT: control target
= control target key end

     0   :  { %8 = vsyncpa [#allocation3], 0  ;;  %s686_s0 = inlined_call_operand.hbm [shape: f32[2,4,256], index: 0, kind: input, shape index: {}]   ;;  %s687_s1 = inlined_call_operand.vmem [shape: f32[4,1], index: 1, kind: input, shape index: {}]   ;;  %s688_s2 = inlined_call_operand.vmem [shape: f32[4,1], index: 2, kind: input, shape index: {}]   ;;  %s689_s3 = inlined_call_operand.hbm [shape: f32[2,4,256], index: 3, kind: output, shape index: {}]  }
   0x1   :  { %10 = vsyncpa [#allocation3 + $0x1], 0 }
   0x2   :  { %11 = vsyncpa [#allocation4], 0 }
   0x3   :  { %13 = vsyncpa [#allocation4 + $0x1], 0  ;;  %s543_s12 = smov 0   ;;  %s545_s13 = smov 0  }
   0x4   :  { %s547_s14 = smov 0   ;;  %s549_s15 = smov 0  }
   0x5 LB: > { %s564_s16 = sadd.s32 4294967295, %s519_s15   ;;  %s355_s17 = sadd.s32 4294967294, %s519_s15   ;;  %s519_s15 = sphi %s549_s15, %s699_s15   ;;  %s515_s14 = sphi %s547_s14, %s698_s14   ;;  %s511_s13 = sphi %s545_s13, %s697_s13   ;;  %s507_s12 = sphi %s543_s12, %s696_s12  }
   0x6   : > { %s568_s18 = sadd.s32 1, %s519_s15   ;;  %s26_s19 = sadd.s32 1, %s515_s14 }
   0x7   : > { %s23_s20 = ssub.s32 %s519_s15, %s568_s18  ;;  %p33_p0 = scmp.ne.s32.totalorder %s515_s14, %s511_s13 }
   0x8   : > { %p24_p1 = scmp.eq.s32.totalorder %s23_s20, 0  ;;  %p34_p2 = scmp.eq.s32.totalorder %s519_s15, 0 }
   0x9   : > { %p39_p3 = scmp.ne.s32.totalorder %s511_s13, %s507_s12  ;;  %p40_p4 = scmp.eq.s32.totalorder %s564_s16, 0 }
   0xa   : > { %s580_s21 = scalar_select %p24_p1, %s515_s14, %s26_s19  }
   0xb   : > { %p582_p5 = por %p34_p2, %p33_p0  ;;  %p586_p6 = por %p40_p4, %p39_p3 }
   0xc   : > { %p105_p7 = scmp.eq.s32.totalorder %s564_s16, 1  ;;  %p111_p8 = scmp.eq.s32.totalorder %s355_s17, 1 }
   0xd   : > { %p383_p10 = scmp.lt.s32.totalorder %s519_s15, 2  ;;  %s137_s26 = sand.u32 1, %s515_s14  }
   0xe   : > { %p593_p11 = por %p105_p7, %p33_p0  ;;  %p597_p12 = por %p111_p8, %p39_p3 }
   0xf   : > { %s369_s27 = sshll.u32 %s519_s15, 3  ;;  %s358_s28 = sshll.u32 %s137_s26, 3 }
  0x10   : > { %s146_s4 = scalar_lea.hbm %s686_s0, %s369_s27  ;;  %s141_s6 = scalar_lea.vmem [#allocation2], %s358_s28 }
  0x11   : > { %s148_s5 = sshll.u32 %s146_s4, 4  ;;  %s150_s7 = sshll.u32 %s141_s6, 4  ;;  %s149_s5 = int_to_ptr.hbm [resolvable:$true] %s148_s5  ;;  %s151_s7 = int_to_ptr.vmem [resolvable:$true] %s150_s7 }
  0x12   : > { %p608_p13 = pnand %p383_p10, %p582_p5  ;;  %p361_p0 = scmp.ge.s32.totalorder %s519_s15, 1 }
  0x13   : > { %p155_p1 = scmp.lt.s32.totalorder %s519_s15, 3  ;;  %s138_s9 = scalar_lea.sflag [#allocation3], %s137_s26 }
  0x14   : > { %s423_s10 = sshra.s32 %s149_s5, 4  ;;  %p427_p3 = pneg %p608_p13  ;;  %s424_s10 = int_to_ptr.hbm [resolvable:$true] %s423_s10 }
  0x15   : > { %s425_s11 = scalar_lea.hbm %s424_s10, 8  ;;  %s430_s20 = scalar_lea.hbm %s686_s0, 16 }
  0x16   : > { %p426_p2 = scmp.ne.s32.totalorder %s424_s10, %s425_s11  ;;  %p431_p5 = scmp.lt.s32.totalorder %s424_s10, %s686_s0 }
  0x17   : > { %p432_p8 = scmp.lt.s32.totalorder %s430_s20, %s425_s11 }
  0x18   : > { %p428_p4 = pnand %p427_p3, %p426_p2 }
  0x19   : > { %p433_p10 = por %p432_p8, %p431_p5 }
  0x1a   : > { %p429_p7 = pneg %p428_p4 }
  0x1c   : > { %p434_p9 = pnand %p433_p10, %p429_p7 }
  0x1e   : > { %437 = shalt.err (!%p434_p9)
}
  0x1f   : > { %378 = dma.hbm_to_vmem [thread:$0]  (!%p608_p13), %s149_s5, 128, %s151_s7, %s138_s9  }
  0x20   : > { %p156_p2 = pnand %p361_p0, %p155_p1 }
  0x21   : > { %s629_s26 = sand.u32 (!%p156_p2), 1, %s511_s13  }
  0x22   : > { %159 = sbr.rel (%p156_p2) target bundleno = 346 (0x15a), region = 32  ;;  %s362_s28 = sshll.u32 (!%p156_p2), %s629_s26, 3 }
  0x23   : > { %s162_s29 = scalar_lea.sflag (!%p156_p2), [#allocation3], %s629_s26  ;;  %s165_s30 = scalar_lea.vmem (!%p156_p2), [#allocation2], %s362_s28 }
  0x27   : > { %498 = dma.done.wait (%p586_p6), %s162_s29, 128  }
  0x28   : > { %500 = vsyncadd (%p586_p6), %s162_s29, 4294967168  ;;  %v639_v0 = vld [vmem:[%s165_s30] sm:$0xff]  ;;  %vm196_vm0 = vcmask 1043456   ;;  %v521_v12 = vmov 0   ;;  %v242_v39 = vld [vmem:[%s687_s1] sm:$0xf] }
  0x29   : > { %191 = vst [vmem:[#allocation1] ss:$2 sm:$0xff] %v639_v0  ;;  %v208_v1 = vmul.f32 %v639_v0, %v639_v0  ;;  %419 = vset.pattern.permute.xlu1 %v521_v12  ;;  %420 = vset.pattern.permute.xlu0 %v521_v12  ;;  %v243_v43 = vld [vmem:[%s688_s2] sm:$0xf]  ;;  %v522_v45 = vmov 839922192  }
  0x2a   : > { %v252_v46 = vunpack.c.l.s4 %v522_v45  ;;  %s370_s7 = sshll.u32 %s564_s16, 3  ;;  %s188_s11 = scalar_lea.vmem [#allocation5], %s362_s28 }
  0x2b   : > { %s280_s10 = scalar_lea.hbm %s689_s3, %s370_s7  ;;  %s282_s17 = sshll.u32 %s188_s11, 4  ;;  %s283_s17 = int_to_ptr.vmem [resolvable:$true] %s282_s17 }
  0x2c   : > { %v253_v48 = vunpack.c.0.s8 %v252_v46  ;;  %s284_s19 = sshll.u32 %s280_s10, 4  ;;  %s269_s20 = scalar_lea.sflag [#allocation4], %s629_s26  ;;  %s285_s19 = int_to_ptr.hbm [resolvable:$true] %s284_s19 }
  0x2d   : > { %s467_s16 = sshra.s32 %s285_s19, 4  ;;  %s473_s28 = scalar_lea.hbm %s689_s3, 16  ;;  %s468_s16 = int_to_ptr.hbm [resolvable:$true] %s467_s16 }
  0x2e   : > { %s469_s22 = scalar_lea.hbm %s468_s16, 8  ;;  %p474_p0 = scmp.lt.s32.totalorder %s468_s16, %s689_s3 }
  0x2f   : > { %p470_p6 = scmp.ne.s32.totalorder %s468_s16, %s469_s22  ;;  %p475_p1 = scmp.lt.s32.totalorder %s473_s28, %s469_s22 }
  0x30   : > { %v192_v2 = vld.sshfl [vmem:[#allocation1] sm:$0xff pattern:$0x75316420]  ;;  %v193_v3 = vld.sshfl [vmem:[#allocation1 + $0x8] sm:$0xff pattern:$0x75316420] }
  0x31   : > { %v197_v4 = vsel %vm196_vm0, %v192_v2, 0.0  ;;  %v198_v5 = vsel %vm196_vm0, %v193_v3, 0.0  ;;  %210 = vst [vmem:[#allocation1] ss:$2 sm:$0xff] %v208_v1  ;;  %p471_p9 = pnand %p470_p6, %p593_p11  ;;  %p476_p3 = por %p475_p1, %p474_p0 }
  0x32   : > { %v199_v6 = vadd.f32 %v198_v5, %v197_v4 }
  0x33   : > { %p472_p13 = pneg %p471_p9 }
  0x34   : > { %200 = vadd.xlane.f32.xlu0 %v199_v6 }
  0x35   : > { %p477_p4 = pnand %p476_p3, %p472_p13 }
  0x38   : > { %v211_v7 = vld.sshfl [vmem:[#allocation1] sm:$0xff pattern:$0x75316420]  ;;  %v212_v8 = vld.sshfl [vmem:[#allocation1 + $0x8] sm:$0xff pattern:$0x75316420] }
  0x39   : > { %v215_v9 = vsel %vm196_vm0, %v211_v7, 0.0  ;;  %v216_v10 = vsel %vm196_vm0, %v212_v8, 0.0 }
  0x3a   : > { %v217_v11 = vadd.f32 %v216_v10, %v215_v9 }
  0x3c   : > { %218 = vadd.xlane.f32.xlu0 %v217_v11 }
  0xa7   : > { %v201_v13 = vpop.xlane.xlu0 %200 }
  0xa8   : > { %v202_v14 = vrot.slane %v201_v13, 4 }
  0xaa   : > { %v203_v15 = vadd.f32 %v202_v14, %v201_v13 }
  0xac   : > { %v204_v16 = vrot.slane %v203_v15, 2 }
  0xae   : > { %v205_v17 = vadd.f32 %v204_v16, %v203_v15 }
  0xaf   : > { %v219_v18 = vpop.xlane.xlu0 %218 }
  0xb0   : > { %v206_v19 = vrot.slane %v205_v17, 1  ;;  %v220_v20 = vrot.slane %v219_v18, 4 }
  0xb2   : > { %v221_v21 = vadd.f32 %v220_v20, %v219_v18  ;;  %v207_v22 = vadd.f32 %v206_v19, %v205_v17 }
  0xb4   : > { %v222_v23 = vrot.slane %v221_v21, 2  ;;  %v226_v26 = vmul.f32 0.0009765625, %v207_v22 }
  0xb6   : > { %v223_v24 = vadd.f32 %v222_v23, %v221_v21  ;;  %v228_v29 = vmul.f32 %v226_v26, %v226_v26 }
  0xb8   : > { %v224_v25 = vrot.slane %v223_v24, 1 }
  0xba   : > { %v225_v27 = vadd.f32 %v224_v25, %v223_v24 }
  0xbc   : > { %v227_v28 = vmul.f32 0.0009765625, %v225_v27 }
  0xbe   : > { %v229_v30 = vsub.f32 %v227_v28, %v228_v29 }
  0xc0   : > { %v230_v31 = vmax.f32 %v229_v30, 0.0 }
  0xc2   : > { %v231_v32 = vadd.f32 1e-05, %v230_v31 }
  0xc4   : > { %421 = vrsqrt.f32 %v231_v32  ;;  %vm238_vm2 = vweird.f32 %v231_v32 }
  0xca   : > { %v422_v33 = vpop.eup %421 }
  0xcb   : > { %v233_v34 = vmul.f32 %v422_v33, %v231_v32  ;;  %vm239_vm1 = vweird.f32 %v422_v33 }
  0xcc   : > { %vm240_vm3 = vmor %vm238_vm2, %vm239_vm1 }
  0xcd   : > { %v234_v35 = vmul.f32 %v422_v33, %v233_v34 }
  0xcf   : > { %v235_v36 = vmul.f32 0.5, %v234_v35 }
  0xd1   : > { %v236_v37 = vsub.f32 1.5, %v235_v36 }
  0xd3   : > { %v237_v38 = vmul.f32 %v422_v33, %v236_v37 }
  0xd5   : > { %v241_v40 = vsel %vm240_vm3, %v422_v33, %v237_v38 }
  0xd6   : > { %v244_v41 = vmul.f32 %v242_v39, %v241_v40 }
  0xd8   : > { %249 = vperm.xlu1 %419, %v244_v41   ;;  %v245_v42 = vmul.f32 %v244_v41, %v226_v26 }
  0xda   : > { %v246_v44 = vsub.f32 %v243_v43, %v245_v42 }
  0xe0   : > { %259 = vperm.xlu1 %419, %v246_v44  }
 0x14a   : > { %v250_v47 = vpop.permute.xlu1 %249 }
 0x14b   : > { %v254_v49 = vperm.slane %v250_v47, %v253_v48 }
 0x14d   : > { %v256_v51 = vmul.f32 %v254_v49, %v639_v0 }
 0x152   : > { %v260_v50 = vpop.permute.xlu1 %259 }
 0x153   : > { %v264_v52 = vperm.slane %v260_v50, %v253_v48 }
 0x155   : > { %v266_v53 = vadd.f32 %v264_v52, %v256_v51 }
 0x157   : > { %267 = vst [vmem:[%s188_s11] sm:$0xff] %v266_v53 }
 0x158   : > { %480 = shalt.err (!%p477_p4)
}
 0x159   : > { %373 = dma.vmem_to_hbm [thread:$0]  (%p593_p11), %s283_s17, 128, %s285_s19, %s269_s20  }
 0x15a PF: > { %s296_s26 = sand.u32 1, %s507_s12   ;;  %p695_p7 = scmp.ge.s32.totalorder %s519_s15, 2 }
 0x15b   : > { %s297_s4 = scalar_lea.sflag [#allocation4], %s296_s26 }
 0x15c   : > { %p380_p5 = pnand %p695_p7, %p597_p12 }
 0x15e   : > { %p381_p8 = pneg %p380_p5 }
 0x160   : > { %502 = dma.done.wait (%p381_p8), %s297_s4, 128  }
 0x161   : > { %504 = vsyncadd (%p381_p8), %s297_s4, 4294967168  ;;  %p16_p10 = scmp.ge.s32.totalorder %s568_s18, 4   ;;  %s696_s12 = smov %s511_s13 }
 0x162   : > { %s697_s13 = smov %s515_s14  ;;  %s698_s14 = smov %s580_s21 }
 0x163   : > { %s699_s15 = smov %s568_s18  ;;  %18 = sbr.rel (!%p16_p10) target bundleno = 5 (0x5), region = 77 }
 0x168   :  { %303 = vsyncpa [#allocation3], 1 }
 0x169   :  { %305 = vsyncpa [#allocation3 + $0x1], 1 }
 0x16a   :  { %306 = vsyncpa [#allocation4], 1 }
 0x16b   :  { %308 = vsyncpa [#allocation4 + $0x1], 1 }

</bundles_post_ra>
